<compile_context>
chip_gen: v5e
topology: v5e:2x2
jax: 0.10.0
libtpu: 0.0.40
codegen_flags: <defaults>
</compile_context>

<pallas_src>
import functools

import jax
import jax.numpy as jnp
from jax.experimental import pallas as pl
from jax.experimental.pallas import tpu as pltpu


def _biaffine_kernel(x1_ref, x2_ref, wc_ref, wb1_ref, wrow_ref, crow_ref, o_ref,
                     *, out_features, d2, l2_chunk, compute_dtype):
    # x1_ref:   (Bb, L1, D1)            x2_ref:  (Bb, L2, D2)
    # wc_ref:   (D1, O*D2)   core weight, o-major columns
    # wb1_ref:  (1,  O*D2)   bias0 column of the weight (zeros if unused), f32
    # wrow_ref: (O,  D1)     bias1 row of the weight (zeros if unused), f32
    # crow_ref: (O,  L1)     bias0*bias1 corner constant broadcast over L1, f32
    # o_ref:    (O, Bb, L2, L1)  lane-dense per-o slabs (lane dim = L1)
    bb, l1, d1 = x1_ref.shape
    _, l2, _ = x2_ref.shape
    f32 = jnp.float32
    cd = compute_dtype

    # ---- first contraction, fused over out_features (N = O*D2 fills the MXU) ----
    x1 = x1_ref[...]
    x1f = x1.reshape(bb * l1, d1).astype(cd)      # sublane-only merge (L1 % 8 == 0 or Bb == 1)
    u = jnp.dot(x1f, wc_ref[...], preferred_element_type=f32)      # (Bb*L1, O*D2), f32 acc
    u = (u + wb1_ref[...]).astype(cd)             # bias0 column folded in (VPU broadcast add)

    # Per-o operand slices (lane slices; tile-aligned whenever D2 % 128 == 0).
    u_os = [u[:, oi * d2:(oi + 1) * d2].reshape(bb, l1, d2)
            for oi in range(out_features)]

    # ---- bias1 row term v[b, i, o] = x1[b, i, :] . wrow[o] + c[o]  (VPU; MXU stays free) ----
    x1_f = x1.astype(f32)
    wrow = wrow_ref[...]
    v_os = []
    for oi in range(out_features):
        vo = jnp.sum(x1_f * wrow[oi], axis=-1) + crow_ref[oi]      # (Bb, L1), f32
        v_os.append(vo[:, None, :])                                # (Bb, 1, L1)

    # ---- second contraction, chunked over L2; store each slab immediately ----
    for start in range(0, l2, l2_chunk):
        size = min(l2_chunk, l2 - start)
        x2c = x2_ref[:, start:start + size, :].astype(cd)          # per-chunk load
        for oi in range(out_features):
            acc = jnp.einsum("bjd,bid->bji", x2c, u_os[oi],
                             preferred_element_type=f32)           # (Bb, size, L1)
            acc = acc + v_os[oi]
            o_ref[oi, :, start:start + size, :] = acc.astype(o_ref.dtype)


def _vmem_capacity_bytes():
    try:
        return int(pltpu.get_tpu_info().vmem_capacity_bytes)
    except Exception:
        return 64 * 1024 * 1024   # v7x floor; conservative for v5e/v6e (128 MiB)


def _vmem_estimate_bytes(bb, l1, l2, d1, d2, o, in_bytes, out_bytes, cd_bytes,
                         l2_chunk):
    x1_blk = bb * l1 * d1 * in_bytes
    x2_blk = bb * l2 * d2 * in_bytes
    out_blk = o * bb * l2 * l1 * out_bytes
    w = d1 * o * d2 * cd_bytes + o * d2 * 4 + o * d1 * 4 + o * l1 * 4
    u = bb * l1 * o * d2 * (4 + cd_bytes)          # f32 accumulation + cast copy
    acc = 2 * bb * l2_chunk * l1 * 4
    # inputs/outputs double-buffered by the pipeline; weight blocks counted x2
    # (constant index map still allocates two buffers).
    return 2 * (x1_blk + x2_blk + out_blk) + 2 * w + u + acc + (2 << 20)


def _choose_batch_block(b, l1, l2, d1, d2, o, in_bytes, out_bytes, cd_bytes,
                        l2_chunk, vmem_budget, target_rows=512):
    """Largest divisor of b that fills the MXU M dim, fits VMEM, keeps the
    (Bb, L1) merge a pure sublane view, and leaves >= 2 parallel grid steps."""
    best = 1
    for cand in range(1, b + 1):
        if b % cand:
            continue
        if cand > 1 and l1 % 8:
            continue                               # keep the row merge a sublane view
        if cand * l1 > max(target_rows, l1):
            continue                               # fill (don't overfill) MXU M dim
        if b >= 2 and b // cand < 2:
            continue                               # >= 2 grid steps (v7x: 2 TensorCores)
        if _vmem_estimate_bytes(cand, l1, l2, d1, d2, o, in_bytes, out_bytes,
                                cd_bytes, l2_chunk) > vmem_budget:
            continue
        best = cand
    return best


def biaffine_pallas(input1, input2, weight, out_features, bias=(True, True),
                    *, compute_dtype=None, transpose_out=True):
    """Pallas implementation of Biaffine.forward.

    input1: (B, L1, in1)  input2: (B, L2, in2)
    weight: (out_features * (in2 + bias1), in1 + bias0)   (nn.Linear weight)
    returns (B, L2, L1, out_features) if transpose_out else (O, B, L2, L1).
    """
    b, l1, d1 = input1.shape
    _, l2, d2 = input2.shape
    o = out_features
    d1b = d1 + int(bias[0])
    d2b = d2 + int(bias[1])
    assert weight.shape == (o * d2b, d1b), weight.shape

    cd = jnp.dtype(compute_dtype) if compute_dtype is not None else jnp.dtype(input1.dtype)
    f32 = jnp.float32

    # ---- one-time weight re-pack in glue (small vs. the activations; the big
    #      input1/input2/output tensors never take an extra HBM pass) ----
    wg = weight.reshape(o, d2b, d1b)
    wc = jnp.transpose(wg[:, :d2, :d1], (2, 0, 1)).reshape(d1, o * d2).astype(cd)
    if bias[0]:
        wb1 = wg[:, :d2, d1].reshape(1, o * d2).astype(f32)
    else:
        wb1 = jnp.zeros((1, o * d2), f32)
    if bias[1]:
        wrow = wg[:, d2, :d1].astype(f32)
    else:
        wrow = jnp.zeros((o, d1), f32)
    if bias[0] and bias[1]:
        cvec = wg[:, d2, d1].astype(f32)
    else:
        cvec = jnp.zeros((o,), f32)
    crow = jnp.broadcast_to(cvec[:, None], (o, l1)).astype(f32)

    in_bytes = jnp.dtype(input1.dtype).itemsize
    out_bytes = in_bytes
    cd_bytes = cd.itemsize

    l2_chunk = min(l2, 256)
    vmem_cap = _vmem_capacity_bytes()
    vmem_budget = int(0.8 * vmem_cap)
    bb = _choose_batch_block(b, l1, l2, d1, d2, o, in_bytes, out_bytes,
                             cd_bytes, l2_chunk, vmem_budget)
    est = _vmem_estimate_bytes(bb, l1, l2, d1, d2, o, in_bytes, out_bytes,
                               cd_bytes, l2_chunk)
    vmem_limit = int(min(0.9 * vmem_cap, max(32 << 20, 1.25 * est)))

    grid = (b // bb,)
    kernel = functools.partial(_biaffine_kernel, out_features=o, d2=d2,
                               l2_chunk=l2_chunk, compute_dtype=cd)

    out_k = pl.pallas_call(
        kernel,
        out_shape=jax.ShapeDtypeStruct((o, b, l2, l1), input1.dtype),
        grid_spec=pltpu.PrefetchScalarGridSpec(
            num_scalar_prefetch=0,
            grid=grid,
            in_specs=[
                pl.BlockSpec((bb, l1, d1), lambda i: (i, 0, 0)),
                pl.BlockSpec((bb, l2, d2), lambda i: (i, 0, 0)),
                # Grid-invariant weight pieces (constant block index).
                pl.BlockSpec((d1, o * d2), lambda i: (0, 0)),
                pl.BlockSpec((1, o * d2), lambda i: (0, 0)),
                pl.BlockSpec((o, d1), lambda i: (0, 0)),
                pl.BlockSpec((o, l1), lambda i: (0, 0)),
            ],
            out_specs=pl.BlockSpec((o, bb, l2, l1), lambda i: (0, i, 0, 0)),
        ),
        compiler_params=pltpu.CompilerParams(
            dimension_semantics=("parallel",),
            vmem_limit_bytes=vmem_limit),
    )(input1, input2, wc, wb1, wrow, crow)

    if transpose_out:
        # Extra HBM pass over the largest tensor; consumers that can take the
        # lane-dense (O, B, L2, L1) layout should pass transpose_out=False.
        return jnp.transpose(out_k, (1, 2, 3, 0))
    return out_k


def biaffine_reference(input1, input2, weight, out_features, bias=(True, True)):
    """Pure-JAX reference mirroring the PyTorch forward exactly."""
    b, l1, _ = input1.shape
    _, l2, _ = input2.shape
    if bias[0]:
        input1 = jnp.concatenate(
            [input1, jnp.ones((b, l1, 1), input1.dtype)], axis=2)
    if bias[1]:
        input2 = jnp.concatenate(
            [input2, jnp.ones((b, l2, 1), input2.dtype)], axis=2)
    d2b = input2.shape[2]
    affine = jnp.einsum("bld,od->blo", input1, weight)        # (B, L1, O*D2b)
    affine = affine.reshape(b, l1 * out_features, d2b)
    biaff = jnp.einsum("bkd,bjd->bkj", affine, input2)        # (B, L1*O, L2)
    biaff = jnp.transpose(biaff, (0, 2, 1))                   # (B, L2, L1*O)
    return biaff.reshape(b, l2, l1, out_features)


if __name__ == "__main__":
    # Shapes consistent with the module's forward:
    #   batch=2, len1=len2=8, in1_features=in2_features=32, out_features=4
    B, L1, L2 = 2, 8, 8
    IN1, IN2, OUT = 32, 32, 4
    BIAS = (True, True)

    key = jax.random.PRNGKey(0)
    k1, k2, kw = jax.random.split(key, 3)

    input1 = jax.random.normal(k1, (B, L1, IN1), dtype=jnp.float32)
    input2 = jax.random.normal(k2, (B, L2, IN2), dtype=jnp.float32)

    # Deterministic nn.Linear-style weight: (out_features*(in2+1), in1+1)
    lin_in = IN1 + int(BIAS[0])
    lin_out = OUT * (IN2 + int(BIAS[1]))
    bound = 1.0 / (lin_in ** 0.5)
    weight = jax.random.uniform(
        kw, (lin_out, lin_in), dtype=jnp.float32, minval=-bound, maxval=bound)

    ref = biaffine_reference(input1, input2, weight, OUT, BIAS)

    # f32 path.
    out = biaffine_pallas(input1, input2, weight, OUT, BIAS)
    out = jax.block_until_ready(out)
    assert out.shape == (B, L2, L1, OUT), out.shape
    assert jnp.allclose(out, ref, atol=5e-4, rtol=5e-4), "f32 mismatch vs reference"

    # bf16-operand / f32-accumulate path (bf16-native MXU on v5e/v6e/v7x).
    out_bf16 = biaffine_pallas(input1, input2, weight, OUT, BIAS,
                               compute_dtype=jnp.bfloat16)
    out_bf16 = jax.block_until_ready(out_bf16)
    assert out_bf16.shape == (B, L2, L1, OUT), out_bf16.shape
    assert jnp.allclose(out_bf16, ref, atol=0.15, rtol=0.05), "bf16 path diverged"

    print("KERNEL_OK")
</pallas_src>

<mosaic_0001>
module attributes {stable_mosaic.version = 11 : i64} {
  func.func @_biaffine_kernel(%arg0: i32, %arg1: memref<1x8x32xf32, #tpu.memory_space<vmem>>, %arg2: memref<1x8x32xf32, #tpu.memory_space<vmem>>, %arg3: memref<32x128xf32, #tpu.memory_space<vmem>>, %arg4: memref<1x128xf32, #tpu.memory_space<vmem>>, %arg5: memref<4x32xf32, #tpu.memory_space<vmem>>, %arg6: memref<4x8xf32, #tpu.memory_space<vmem>>, %arg7: memref<4x1x8x8xf32, #tpu.memory_space<vmem>>) attributes {dimension_semantics = [#tpu.dimension_semantics<parallel>], iteration_bounds = array<i64: 2>, scalar_prefetch = 0 : i64, scratch_operands = 0 : i64, tpu.core_type = #tpu.core_type<tc>, window_params = [{transform_indices = @transform_0, window_bounds = array<i64: 1, 8, 32>}, {transform_indices = @transform_1, window_bounds = array<i64: 1, 8, 32>}, {pipeline_mode = #tpu.pipeline_mode<synchronous>, transform_indices = @transform_2, window_bounds = array<i64: 32, 128>}, {pipeline_mode = #tpu.pipeline_mode<synchronous>, transform_indices = @transform_3, window_bounds = array<i64: 1, 128>}, {pipeline_mode = #tpu.pipeline_mode<synchronous>, transform_indices = @transform_4, window_bounds = array<i64: 4, 32>}, {pipeline_mode = #tpu.pipeline_mode<synchronous>, transform_indices = @transform_5, window_bounds = array<i64: 4, 8>}, {transform_indices = @transform_6, window_bounds = array<i64: 4, 1, 8, 8>}]} {
    %c0 = arith.constant 0 : index
    %c0_0 = arith.constant 0 : index
    %c0_1 = arith.constant 0 : index
    %0 = vector.load %arg1[%c0, %c0_0, %c0_1] : memref<1x8x32xf32, #tpu.memory_space<vmem>>, vector<1x8x32xf32>
    %1 = vector.shape_cast %0 : vector<1x8x32xf32> to vector<8x32xf32>
    %c0_2 = arith.constant 0 : index
    %c0_3 = arith.constant 0 : index
    %2 = vector.load %arg3[%c0_2, %c0_3] : memref<32x128xf32, #tpu.memory_space<vmem>>, vector<32x128xf32>
    %cst = arith.constant dense<0.000000e+00> : vector<8x128xf32>
    %3 = tpu.matmul %1, %2, %cst {dimension_numbers = #tpu.dot_dimension_numbers<[1], [0], [0], [1], [0, 0, 1, 1], [], []>} : vector<8x32xf32>, vector<32x128xf32>, vector<8x128xf32> -> vector<8x128xf32>
    %c0_4 = arith.constant 0 : index
    %c0_5 = arith.constant 0 : index
    %4 = vector.load %arg4[%c0_4, %c0_5] : memref<1x128xf32, #tpu.memory_space<vmem>>, vector<1x128xf32>
    %5 = vector.broadcast %4 : vector<1x128xf32> to vector<8x128xf32>
    %6 = arith.addf %3, %5 : vector<8x128xf32>
    %7 = vector.extract_strided_slice %6 {offsets = [0, 0], sizes = [8, 32], strides = [1, 1]} : vector<8x128xf32> to vector<8x32xf32>
    %8 = vector.shape_cast %7 : vector<8x32xf32> to vector<1x8x32xf32>
    %9 = vector.extract_strided_slice %6 {offsets = [0, 32], sizes = [8, 32], strides = [1, 1]} : vector<8x128xf32> to vector<8x32xf32>
    %10 = vector.shape_cast %9 : vector<8x32xf32> to vector<1x8x32xf32>
    %11 = vector.extract_strided_slice %6 {offsets = [0, 64], sizes = [8, 32], strides = [1, 1]} : vector<8x128xf32> to vector<8x32xf32>
    %12 = vector.shape_cast %11 : vector<8x32xf32> to vector<1x8x32xf32>
    %13 = vector.extract_strided_slice %6 {offsets = [0, 96], sizes = [8, 32], strides = [1, 1]} : vector<8x128xf32> to vector<8x32xf32>
    %14 = vector.shape_cast %13 : vector<8x32xf32> to vector<1x8x32xf32>
    %c0_6 = arith.constant 0 : index
    %c0_7 = arith.constant 0 : index
    %15 = vector.load %arg5[%c0_6, %c0_7] : memref<4x32xf32, #tpu.memory_space<vmem>>, vector<4x32xf32>
    %16 = vector.extract_strided_slice %15 {offsets = [0, 0], sizes = [1, 32], strides = [1, 1]} : vector<4x32xf32> to vector<1x32xf32>
    %17 = vector.shape_cast %16 : vector<1x32xf32> to vector<32xf32>
    %18 = vector.shape_cast %17 : vector<32xf32> to vector<1x1x32xf32>
    %19 = vector.broadcast %18 : vector<1x1x32xf32> to vector<1x8x32xf32>
    %20 = arith.mulf %0, %19 : vector<1x8x32xf32>
    %cst_8 = arith.constant dense<0.000000e+00> : vector<1x8xf32>
    %21 = vector.multi_reduction <add>, %20, %cst_8 [2] : vector<1x8x32xf32> to vector<1x8xf32>
    %c0_9 = arith.constant 0 : index
    %c0_10 = arith.constant 0 : index
    %22 = vector.load %arg6[%c0_9, %c0_10] : memref<4x8xf32, #tpu.memory_space<vmem>>, vector<1x8xf32>
    %23 = vector.shape_cast %22 : vector<1x8xf32> to vector<8xf32>
    %24 = vector.shape_cast %23 : vector<8xf32> to vector<1x8xf32>
    %25 = arith.addf %21, %24 : vector<1x8xf32>
    %26 = vector.shape_cast %25 : vector<1x8xf32> to vector<1x1x8xf32>
    %27 = vector.extract_strided_slice %15 {offsets = [1, 0], sizes = [1, 32], strides = [1, 1]} : vector<4x32xf32> to vector<1x32xf32>
    %28 = vector.shape_cast %27 : vector<1x32xf32> to vector<32xf32>
    %29 = vector.shape_cast %28 : vector<32xf32> to vector<1x1x32xf32>
    %30 = vector.broadcast %29 : vector<1x1x32xf32> to vector<1x8x32xf32>
    %31 = arith.mulf %0, %30 : vector<1x8x32xf32>
    %cst_11 = arith.constant dense<0.000000e+00> : vector<1x8xf32>
    %32 = vector.multi_reduction <add>, %31, %cst_11 [2] : vector<1x8x32xf32> to vector<1x8xf32>
    %c1 = arith.constant 1 : index
    %c0_12 = arith.constant 0 : index
    %33 = vector.load %arg6[%c1, %c0_12] : memref<4x8xf32, #tpu.memory_space<vmem>>, vector<1x8xf32>
    %34 = vector.shape_cast %33 : vector<1x8xf32> to vector<8xf32>
    %35 = vector.shape_cast %34 : vector<8xf32> to vector<1x8xf32>
    %36 = arith.addf %32, %35 : vector<1x8xf32>
    %37 = vector.shape_cast %36 : vector<1x8xf32> to vector<1x1x8xf32>
    %38 = vector.extract_strided_slice %15 {offsets = [2, 0], sizes = [1, 32], strides = [1, 1]} : vector<4x32xf32> to vector<1x32xf32>
    %39 = vector.shape_cast %38 : vector<1x32xf32> to vector<32xf32>
    %40 = vector.shape_cast %39 : vector<32xf32> to vector<1x1x32xf32>
    %41 = vector.broadcast %40 : vector<1x1x32xf32> to vector<1x8x32xf32>
    %42 = arith.mulf %0, %41 : vector<1x8x32xf32>
    %cst_13 = arith.constant dense<0.000000e+00> : vector<1x8xf32>
    %43 = vector.multi_reduction <add>, %42, %cst_13 [2] : vector<1x8x32xf32> to vector<1x8xf32>
    %c2 = arith.constant 2 : index
    %c0_14 = arith.constant 0 : index
    %44 = vector.load %arg6[%c2, %c0_14] : memref<4x8xf32, #tpu.memory_space<vmem>>, vector<1x8xf32>
    %45 = vector.shape_cast %44 : vector<1x8xf32> to vector<8xf32>
    %46 = vector.shape_cast %45 : vector<8xf32> to vector<1x8xf32>
    %47 = arith.addf %43, %46 : vector<1x8xf32>
    %48 = vector.shape_cast %47 : vector<1x8xf32> to vector<1x1x8xf32>
    %49 = vector.extract_strided_slice %15 {offsets = [3, 0], sizes = [1, 32], strides = [1, 1]} : vector<4x32xf32> to vector<1x32xf32>
    %50 = vector.shape_cast %49 : vector<1x32xf32> to vector<32xf32>
    %51 = vector.shape_cast %50 : vector<32xf32> to vector<1x1x32xf32>
    %52 = vector.broadcast %51 : vector<1x1x32xf32> to vector<1x8x32xf32>
    %53 = arith.mulf %0, %52 : vector<1x8x32xf32>
    %cst_15 = arith.constant dense<0.000000e+00> : vector<1x8xf32>
    %54 = vector.multi_reduction <add>, %53, %cst_15 [2] : vector<1x8x32xf32> to vector<1x8xf32>
    %c3 = arith.constant 3 : index
    %c0_16 = arith.constant 0 : index
    %55 = vector.load %arg6[%c3, %c0_16] : memref<4x8xf32, #tpu.memory_space<vmem>>, vector<1x8xf32>
    %56 = vector.shape_cast %55 : vector<1x8xf32> to vector<8xf32>
    %57 = vector.shape_cast %56 : vector<8xf32> to vector<1x8xf32>
    %58 = arith.addf %54, %57 : vector<1x8xf32>
    %59 = vector.shape_cast %58 : vector<1x8xf32> to vector<1x1x8xf32>
    %c0_17 = arith.constant 0 : index
    %c0_18 = arith.constant 0 : index
    %c0_19 = arith.constant 0 : index
    %60 = vector.load %arg2[%c0_17, %c0_18, %c0_19] : memref<1x8x32xf32, #tpu.memory_space<vmem>>, vector<1x8x32xf32>
    "tpu.trace_start"() <{level = 10 : i32, message = "bjd,bid->bji"}> : () -> ()
    %cst_20 = arith.constant dense<0.000000e+00> : vector<1x8x8xf32>
    %61 = tpu.matmul %60, %8, %cst_20 {dimension_numbers = #tpu.dot_dimension_numbers<[2], [2], [1], [1], [0, 0, 0, 1, 1, 1], [0], [0]>} : vector<1x8x32xf32>, vector<1x8x32xf32>, vector<1x8x8xf32> -> vector<1x8x8xf32>
    "tpu.trace_stop"() : () -> ()
    %62 = vector.broadcast %26 : vector<1x1x8xf32> to vector<1x8x8xf32>
    %63 = arith.addf %61, %62 : vector<1x8x8xf32>
    %c0_21 = arith.constant 0 : index
    %c0_22 = arith.constant 0 : index
    %c0_23 = arith.constant 0 : index
    %c0_24 = arith.constant 0 : index
    %64 = vector.load %arg7[%c0_21, %c0_22, %c0_23, %c0_24] : memref<4x1x8x8xf32, #tpu.memory_space<vmem>>, vector<1x1x8x8xf32>
    %65 = vector.shape_cast %64 : vector<1x1x8x8xf32> to vector<1x8x8xf32>
    %66 = vector.shape_cast %63 : vector<1x8x8xf32> to vector<1x1x8x8xf32>
    tpu.vector_store %arg7[%c0_21, %c0_22, %c0_23, %c0_24], %66 {strides = array<i32>} : memref<4x1x8x8xf32, #tpu.memory_space<vmem>>, vector<1x1x8x8xf32>,
    "tpu.trace_start"() <{level = 10 : i32, message = "bjd,bid->bji"}> : () -> ()
    %cst_25 = arith.constant dense<0.000000e+00> : vector<1x8x8xf32>
    %67 = tpu.matmul %60, %10, %cst_25 {dimension_numbers = #tpu.dot_dimension_numbers<[2], [2], [1], [1], [0, 0, 0, 1, 1, 1], [0], [0]>} : vector<1x8x32xf32>, vector<1x8x32xf32>, vector<1x8x8xf32> -> vector<1x8x8xf32>
    "tpu.trace_stop"() : () -> ()
    %68 = vector.broadcast %37 : vector<1x1x8xf32> to vector<1x8x8xf32>
    %69 = arith.addf %67, %68 : vector<1x8x8xf32>
    %c1_26 = arith.constant 1 : index
    %c0_27 = arith.constant 0 : index
    %c0_28 = arith.constant 0 : index
    %c0_29 = arith.constant 0 : index
    %70 = vector.load %arg7[%c1_26, %c0_27, %c0_28, %c0_29] : memref<4x1x8x8xf32, #tpu.memory_space<vmem>>, vector<1x1x8x8xf32>
    %71 = vector.shape_cast %70 : vector<1x1x8x8xf32> to vector<1x8x8xf32>
    %72 = vector.shape_cast %69 : vector<1x8x8xf32> to vector<1x1x8x8xf32>
    tpu.vector_store %arg7[%c1_26, %c0_27, %c0_28, %c0_29], %72 {strides = array<i32>} : memref<4x1x8x8xf32, #tpu.memory_space<vmem>>, vector<1x1x8x8xf32>,
    "tpu.trace_start"() <{level = 10 : i32, message = "bjd,bid->bji"}> : () -> ()
    %cst_30 = arith.constant dense<0.000000e+00> : vector<1x8x8xf32>
    %73 = tpu.matmul %60, %12, %cst_30 {dimension_numbers = #tpu.dot_dimension_numbers<[2], [2], [1], [1], [0, 0, 0, 1, 1, 1], [0], [0]>} : vector<1x8x32xf32>, vector<1x8x32xf32>, vector<1x8x8xf32> -> vector<1x8x8xf32>
    "tpu.trace_stop"() : () -> ()
    %74 = vector.broadcast %48 : vector<1x1x8xf32> to vector<1x8x8xf32>
    %75 = arith.addf %73, %74 : vector<1x8x8xf32>
    %c2_31 = arith.constant 2 : index
    %c0_32 = arith.constant 0 : index
    %c0_33 = arith.constant 0 : index
    %c0_34 = arith.constant 0 : index
    %76 = vector.load %arg7[%c2_31, %c0_32, %c0_33, %c0_34] : memref<4x1x8x8xf32, #tpu.memory_space<vmem>>, vector<1x1x8x8xf32>
    %77 = vector.shape_cast %76 : vector<1x1x8x8xf32> to vector<1x8x8xf32>
    %78 = vector.shape_cast %75 : vector<1x8x8xf32> to vector<1x1x8x8xf32>
    tpu.vector_store %arg7[%c2_31, %c0_32, %c0_33, %c0_34], %78 {strides = array<i32>} : memref<4x1x8x8xf32, #tpu.memory_space<vmem>>, vector<1x1x8x8xf32>,
    "tpu.trace_start"() <{level = 10 : i32, message = "bjd,bid->bji"}> : () -> ()
    %cst_35 = arith.constant dense<0.000000e+00> : vector<1x8x8xf32>
    %79 = tpu.matmul %60, %14, %cst_35 {dimension_numbers = #tpu.dot_dimension_numbers<[2], [2], [1], [1], [0, 0, 0, 1, 1, 1], [0], [0]>} : vector<1x8x32xf32>, vector<1x8x32xf32>, vector<1x8x8xf32> -> vector<1x8x8xf32>
    "tpu.trace_stop"() : () -> ()
    %80 = vector.broadcast %59 : vector<1x1x8xf32> to vector<1x8x8xf32>
    %81 = arith.addf %79, %80 : vector<1x8x8xf32>
    %c3_36 = arith.constant 3 : index
    %c0_37 = arith.constant 0 : index
    %c0_38 = arith.constant 0 : index
    %c0_39 = arith.constant 0 : index
    %82 = vector.load %arg7[%c3_36, %c0_37, %c0_38, %c0_39] : memref<4x1x8x8xf32, #tpu.memory_space<vmem>>, vector<1x1x8x8xf32>
    %83 = vector.shape_cast %82 : vector<1x1x8x8xf32> to vector<1x8x8xf32>
    %84 = vector.shape_cast %81 : vector<1x8x8xf32> to vector<1x1x8x8xf32>
    tpu.vector_store %arg7[%c3_36, %c0_37, %c0_38, %c0_39], %84 {strides = array<i32>} : memref<4x1x8x8xf32, #tpu.memory_space<vmem>>, vector<1x1x8x8xf32>,
    return
  }
  func.func @transform_0(%arg0: i32) -> (i32, i32, i32) {
    %c0_i32 = arith.constant 0 : i32
    %c0_i32_0 = arith.constant 0 : i32
    %c0_i32_1 = arith.constant 0 : i32
    return %arg0, %c0_i32, %c0_i32_0 : i32, i32, i32
  }
  func.func @transform_1(%arg0: i32) -> (i32, i32, i32) {
    %c0_i32 = arith.constant 0 : i32
    %c0_i32_0 = arith.constant 0 : i32
    %c0_i32_1 = arith.constant 0 : i32
    return %arg0, %c0_i32, %c0_i32_0 : i32, i32, i32
  }
  func.func @transform_2(%arg0: i32) -> (i32, i32) {
    %c0_i32 = arith.constant 0 : i32
    %c0_i32_0 = arith.constant 0 : i32
    %c0_i32_1 = arith.constant 0 : i32
    return %c0_i32, %c0_i32_0 : i32, i32
  }
  func.func @transform_3(%arg0: i32) -> (i32, i32) {
    %c0_i32 = arith.constant 0 : i32
    %c0_i32_0 = arith.constant 0 : i32
    %c0_i32_1 = arith.constant 0 : i32
    return %c0_i32, %c0_i32_0 : i32, i32
  }
  func.func @transform_4(%arg0: i32) -> (i32, i32) {
    %c0_i32 = arith.constant 0 : i32
    %c0_i32_0 = arith.constant 0 : i32
    %c0_i32_1 = arith.constant 0 : i32
    return %c0_i32, %c0_i32_0 : i32, i32
  }
  func.func @transform_5(%arg0: i32) -> (i32, i32) {
    %c0_i32 = arith.constant 0 : i32
    %c0_i32_0 = arith.constant 0 : i32
    %c0_i32_1 = arith.constant 0 : i32
    return %c0_i32, %c0_i32_0 : i32, i32
  }
  func.func @transform_6(%arg0: i32) -> (i32, i32, i32, i32) {
    %c0_i32 = arith.constant 0 : i32
    %c0_i32_0 = arith.constant 0 : i32
    %c0_i32_1 = arith.constant 0 : i32
    %c0_i32_2 = arith.constant 0 : i32
    return %c0_i32, %arg0, %c0_i32_0, %c0_i32_1 : i32, i32, i32, i32
  }
}

</mosaic_0001>

<bundles_post_ra>
// kernel: tpu_custom_call.1
= control target key start
LH: loop header
LB: loop body
LE: loop exit
PB: predicated region body
PF: predicated region fallthrough
CT: control target
= control target key end

     0   :  { %s1383_s0 = inlined_call_operand.hbm [shape: f32[2,8,32], index: 0, kind: input, shape index: {}]   ;;  %s1384_s1 = inlined_call_operand.hbm [shape: f32[2,8,32], index: 1, kind: input, shape index: {}]   ;;  %s1385_s2 = inlined_call_operand.hbm [shape: f32[32,128], index: 2, kind: input, shape index: {}]   ;;  %s1386_s3 = inlined_call_operand.hbm [shape: f32[1,128], index: 3, kind: input, shape index: {}]   ;;  %s1387_s4 = inlined_call_operand.hbm [shape: f32[4,32], index: 4, kind: input, shape index: {}]   ;;  %s1388_s5 = inlined_call_operand.vmem [shape: f32[4,8], index: 5, kind: input, shape index: {}]   ;;  %s1389_s6 = inlined_call_operand.hbm [shape: f32[4,2,8,8], index: 6, kind: output, shape index: {}]  }
   0x1   :  { %1391 = sst [smem:[#allocation19_spill]] %s1385_s2 }
   0x2   :  { %1392 = sst [smem:[#allocation20_spill]] %s1386_s3 }
   0x3   :  { %1393 = sst [smem:[#allocation21_spill]] %s1387_s4 }
   0x4   :  { %11 = vsyncpa [#allocation3], 0 }
   0x5   :  { %13 = vsyncpa [#allocation3 + $0x1], 0 }
   0x6   :  { %14 = vsyncpa [#allocation6], 0 }
   0x7   :  { %16 = vsyncpa [#allocation6 + $0x1], 0 }
   0x8   :  { %17 = vsyncpa [#allocation9], 0 }
   0x9   :  { %18 = vsyncpa [#allocation4], 0 }
   0xa   :  { %20 = vsyncpa [#allocation4 + $0x1], 0  ;;  %s1165_s21 = smov 0   ;;  %s1167_s22 = smov 0  }
   0xb   :  { %s1169_s23 = smov 0   ;;  %s1171_s24 = smov 0  }
   0xc LB: > { %1394 = sst [smem:[#allocation17_spill]] %s1112_s23  ;;  %s1189_s28 = sadd.s32 4294967295, %s1116_s24   ;;  %s1116_s24 = sphi %s1171_s24, %s1411_s24   ;;  %s1112_s23 = sphi %s1169_s23, %s1408_s23   ;;  %s1108_s22 = sphi %s1167_s22, %s1410_s22   ;;  %s1104_s21 = sphi %s1165_s21, %s1409_s21  }
   0xd   : > { %s1395_s2 = sld [smem:[#allocation19_spill]]  ;;  %p754_p0 = scmp.ge.s32.totalorder %s1116_s24, 1 }
   0xe   : > { %p47_p1 = scmp.eq.s32.totalorder %s1189_s28, 0  ;;  %p193_p2 = scmp.lt.s32.totalorder %s1116_s24, 3 }
   0xf   : > { %s1118_s30 = smov [#allocation7]   ;;  %s1397_s3 = sld [smem:[#allocation20_spill]] }
  0x10   : > { %p1194_p3 = pnand %p754_p0, %p193_p2  ;;  %s206_s7 = sshll.u32 %s1118_s30, 4  ;;  %s207_s7 = int_to_ptr.vmem [resolvable:$true] %s206_s7 }
  0x11   : > { %s1399_s4 = sld [smem:[#allocation21_spill]]  ;;  %s1119_s15 = smov [#allocation8]  }
  0x12   : > { %p804_p4 = pneg %p1194_p3  ;;  %s221_s16 = sshll.u32 %s1119_s15, 4  ;;  %s222_s16 = int_to_ptr.vmem [resolvable:$true] %s221_s16 }
  0x13   : > { %s204_s27 = sshll.u32 %s1395_s2, 4  ;;  %s1120_s17 = smov 128   ;;  %s205_s27 = int_to_ptr.hbm [resolvable:$true] %s204_s27 }
  0x14   : > { %p1206_p6 = pnand %p804_p4, %p47_p1  ;;  %s1121_s18 = smov 8  }
  0x15   : > { %s219_s10 = sshll.u32 %s1397_s3, 4  ;;  %s1122_s19 = smov [#allocation10]   ;;  %s220_s10 = int_to_ptr.hbm [resolvable:$true] %s219_s10 }
  0x16   : > { %807 = dma.hbm_to_vmem [thread:$0]  (!%p1206_p6), %s205_s27, 512, %s207_s7, [#allocation6], %s1120_s17, %s1120_s17, %s1121_s18  }
  0x17   : > { %s231_s14 = sshll.u32 %s1399_s4, 4  ;;  %s233_s20 = sshll.u32 %s1122_s19, 4  ;;  %s232_s14 = int_to_ptr.hbm [resolvable:$true] %s231_s14  ;;  %s234_s20 = int_to_ptr.vmem [resolvable:$true] %s233_s20 }
  0x18   : > { %810 = dma.hbm_to_vmem [thread:$0]  (!%p1206_p6), %s220_s10, 16, %s222_s16, [#allocation9]  }
  0x19   : > { %813 = dma.hbm_to_vmem [thread:$0]  (!%p1206_p6), %s232_s14, 64, %s234_s20, [#allocation9]  }
  0x1a   : > { %s753_s25 = sadd.s32 4294967294, %s1116_s24   ;;  %s1221_s26 = sadd.s32 1, %s1116_s24  }
  0x1b   : > { %s33_s30 = sadd.s32 1, %s1112_s23  ;;  %s30_s27 = ssub.s32 %s1116_s24, %s1221_s26 }
  0x1c   : > { %p40_p7 = scmp.ne.s32.totalorder %s1112_s23, %s1108_s22  ;;  %p31_p8 = scmp.eq.s32.totalorder %s30_s27, 0 }
  0x1d   : > { %p41_p9 = scmp.eq.s32.totalorder %s1116_s24, 0  ;;  %p46_p10 = scmp.ne.s32.totalorder %s1108_s22, %s1104_s21 }
  0x1e   : > { %p180_p11 = scmp.eq.s32.totalorder %s1189_s28, 1  ;;  %p186_p2 = scmp.eq.s32.totalorder %s753_s25, 1 }
  0x1f   : > { %s1233_s7 = scalar_select %p31_p8, %s1112_s23, %s33_s30  }
  0x20   : > { %p1235_p12 = por %p41_p9, %p40_p7  ;;  %p1241_p13 = por %p47_p1, %p46_p10 }
  0x21   : > { %1400 = sst [smem:[#allocation18_spill]] %s1233_s7  ;;  %p1245_p0 = por %p180_p11, %p40_p7 }
  0x22   : > { %p828_p4 = scmp.lt.s32.totalorder %s1116_s24, 2  ;;  %s247_s11 = sand.u32 1, %s1112_s23  }
  0x23   : > { %p1251_p6 = por %p186_p2, %p46_p10  ;;  %s759_s13 = sshll.u32 %s247_s11, 3 }
  0x24   : > { %s760_s14 = sshll.u32 %s1116_s24, 3  ;;  %s251_s19 = scalar_lea.vmem [#allocation2], %s759_s13 }
  0x25   : > { %s255_s17 = scalar_lea.hbm %s1383_s0, %s760_s14  ;;  %s259_s20 = sshll.u32 %s251_s19, 4  ;;  %s260_s20 = int_to_ptr.vmem [resolvable:$true] %s259_s20 }
  0x26   : > { %s257_s18 = sshll.u32 %s255_s17, 4  ;;  %p1261_p7 = pnand %p828_p4, %p1235_p12  ;;  %s258_s18 = int_to_ptr.hbm [resolvable:$true] %s257_s18 }
  0x27   : > { %s274_s2 = scalar_lea.hbm %s1384_s1, %s760_s14  ;;  %s266_s3 = sand.u32 1, %s1116_s24  }
  0x28   : > { %s248_s4 = scalar_lea.sflag [#allocation3], %s247_s11  ;;  %s978_s15 = sshra.s32 %s258_s18, 4  ;;  %s979_s15 = int_to_ptr.hbm [resolvable:$true] %s978_s15 }
  0x29   : > { %s980_s16 = scalar_lea.hbm %s979_s15, 8  ;;  %p982_p9 = pneg %p1261_p7 }
  0x2a   : > { %p981_p8 = scmp.ne.s32.totalorder %s979_s15, %s980_s16  ;;  %s985_s19 = scalar_lea.hbm %s1383_s0, 16 }
  0x2b   : > { %p986_p12 = scmp.lt.s32.totalorder %s979_s15, %s1383_s0  ;;  %p987_p2 = scmp.lt.s32.totalorder %s985_s19, %s980_s16 }
  0x2c   : > { %p983_p10 = pnand %p982_p9, %p981_p8 }
  0x2d   : > { %p988_p4 = por %p987_p2, %p986_p12 }
  0x2e   : > { %p984_p11 = pneg %p983_p10 }
  0x30   : > { %p989_p5 = pnand %p988_p4, %p984_p11 }
  0x32   : > { %992 = shalt.err (!%p989_p5)
}
  0x33   : > { %817 = dma.hbm_to_vmem [thread:$0]  (!%p1261_p7), %s258_s18, 128, %s260_s20, %s248_s4  }
  0x34   : > { %s276_s11 = sshll.u32 %s274_s2, 4  ;;  %s270_s14 = scalar_lea.vmem [#allocation5], %s759_s13  ;;  %s277_s11 = int_to_ptr.hbm [resolvable:$true] %s276_s11 }
  0x35   : > { %s278_s7 = sshll.u32 %s270_s14, 4  ;;  %s267_s23 = scalar_lea.sflag [#allocation6], %s266_s3  ;;  %s279_s7 = int_to_ptr.vmem [resolvable:$true] %s278_s7 }
  0x36   : > { %s1008_s8 = sshra.s32 %s277_s11, 4  ;;  %s1015_s19 = scalar_lea.hbm %s1384_s1, 16  ;;  %s1009_s8 = int_to_ptr.hbm [resolvable:$true] %s1008_s8 }
  0x37   : > { %s1010_s17 = scalar_lea.hbm %s1009_s8, 8  ;;  %p1016_p5 = scmp.lt.s32.totalorder %s1009_s8, %s1384_s1 }
  0x38   : > { %p1011_p8 = scmp.ne.s32.totalorder %s1009_s8, %s1010_s17  ;;  %p1017_p11 = scmp.lt.s32.totalorder %s1015_s19, %s1010_s17 }
  0x3a   : > { %p1013_p10 = pnand %p1011_p8, %p982_p9  ;;  %p1018_p2 = por %p1017_p11, %p1016_p5 }
  0x3c   : > { %p1014_p12 = pneg %p1013_p10 }
  0x3e   : > { %p1019_p4 = pnand %p1018_p2, %p1014_p12 }
  0x40   : > { %1022 = shalt.err (!%p1019_p4)
}
  0x41   : > { %820 = dma.hbm_to_vmem [thread:$0]  (!%p1261_p7), %s277_s11, 128, %s279_s7, %s267_s23  }
  0x42   : > { %287 = sbr.rel (%p1194_p3) target bundleno = 508 (0x1fc), region = 44  ;;  %s1296_s2 = sand.u32 (!%p1194_p3), 1, %s1108_s22  }
  0x43   : > { %s764_s3 = sshll.u32 (!%p1194_p3), %s1296_s2, 3  ;;  %s290_s13 = scalar_lea.sflag (!%p1194_p3), [#allocation3], %s1296_s2 }
  0x44   : > { %s293_s18 = scalar_lea.vmem (!%p1194_p3), [#allocation2], %s764_s3 }
  0x47   : > { %1083 = dma.done.wait (%p1241_p13), %s290_s13, 128  }
  0x48   : > { %1085 = vsyncadd (%p1241_p13), %s290_s13, 4294967168  ;;  %s299_s23 = sand.u32 1, %s1189_s28   ;;  %s1305_s29 = scalar_lea.vmem [#allocation5], %s764_s3 }
  0x49   : > { %s300_s7 = scalar_lea.sflag [#allocation6], %s299_s23 }
  0x4a   : > { %1087 = dma.done.wait (%p1241_p13), %s300_s7, 128  }
  0x4b   : > { %1089 = vsyncadd (%p1241_p13), %s300_s7, 4294967168 }
  0x4c   : > { %1091 = dma.done.wait (%p47_p1), [#allocation6], 512  }
  0x4d   : > { %1093 = vsyncadd (%p47_p1), [#allocation6], 4294966784 }
  0x4e   : > { %1095 = dma.done.wait (%p47_p1), [#allocation9], 80  }
  0x4f   : > { %1097 = vsyncadd (%p47_p1), [#allocation9], 4294967216  ;;  %v357_v0 = vld [vmem:[#allocation7 + $0x18] sm:$0xff]  ;;  %v356_v1 = vld [vmem:[#allocation7 + $0x10] sm:$0xff]  ;;  %vm362_vm0 = vcmask 261120   ;;  %s1123_s9 = smov 32   ;;  %v395_v15 = vlaneseq }
  0x50   : > { %378 = vmatpush.msra.mxu0 %v357_v0  ;;  %v355_v2 = vld [vmem:[#allocation7 + $0x8] sm:$0xff]  ;;  %v354_v3 = vld [vmem:[#allocation7] sm:$0xff]  ;;  %s1124_s20 = smov 96   ;;  %s1125_s25 = smov 64   ;;  %v451_v27 = vld [vmem:[%s1305_s29] sm:$0xff]  ;;  %v1126_v31 = vmov 0  }
  0x51   : > { %v353_v4 = vld [vmem:[%s293_s18] sm:$0xff]  ;;  %v396_v16 = vshrl.u32 %v395_v15, 7  ;;  %v457_v44 = vand.u32 127, %v395_v15  ;;  %s769_s30 = sshll.u32 %s1296_s2, 5  ;;  %vm498_vm1 = vcmask 64512   ;;  %s783_s4 = sshll.u32 %s1189_s28, 3 }
  0x52   : > { %379 = vmatpush.msra.mxu0 %v356_v1  ;;  %v386_v5 = vld [vmem:[#allocation10] sm:$0xf]  ;;  %v883_v12 = vld [vmem:[#allocation8] ss:$0 sm:$0xff]  ;;  %v886_v25 = vld [vmem:[%s1388_s5 + $0x1] ss:$0 sm:$0xff]  ;;  %s625_s23 = scalar_lea.hbm %s1389_s6, %s783_s4 }
  0x53   : > { %v403_v6 = vperm.slane %v386_v5, 1  ;;  %v435_v8 = vperm.slane %v386_v5, 3  ;;  %877 = vset.pattern.permute.xlu2 %v396_v16  ;;  %878 = vset.pattern.permute.xlu1 %v396_v16  ;;  %v884_v17 = vld [vmem:[%s1388_s5] ss:$0 sm:$0xff]  ;;  %v387_v18 = vperm.slane %v386_v5, 0  ;;  %v419_v22 = vperm.slane %v386_v5, 2 }
  0x54   : > { %380 = vmatpush.msra.mxu0 %v355_v2  ;;  %879 = vset.pattern.permute.xlu0 %v396_v16  ;;  %v885_v19 = vld [vmem:[%s1388_s5 + $0x2] ss:$0 sm:$0xff]  ;;  %v887_v26 = vld [vmem:[%s1388_s5 + $0x3] ss:$0 sm:$0xff]  ;;  %s352_s3 = scalar_lea.vmem [#allocation11], %s769_s30  ;;  %s628_s29 = sshll.u32 %s625_s23, 4  ;;  %s629_s29 = int_to_ptr.hbm [resolvable:$true] %s628_s29 }
  0x55   : > { %v404_v7 = vmul.f32 %v403_v6, %v353_v4  ;;  %v436_v10 = vmul.f32 %v435_v8, %v353_v4  ;;  %v388_v20 = vmul.f32 %v387_v18, %v353_v4  ;;  %v420_v23 = vmul.f32 %v419_v22, %v353_v4  ;;  %s626_s7 = sshll.u32 %s352_s3, 4  ;;  %s615_s28 = scalar_lea.sflag [#allocation4], %s1296_s2  ;;  %s627_s7 = int_to_ptr.vmem [resolvable:$true] %s626_s7 }
  0x56   : > { %381 = vmatpush.msra.mxu0 %v354_v3  ;;  %s1058_s11 = scalar_lea.hbm %s1389_s6, 64 }
  0x57   : > { %770 = vmatmul.msk.f32.vlgmr.msra.gmra.mxu0 %vm362_vm0, %v353_v4  ;;  %v405_v9 = vsel %vm362_vm0, %v404_v7, 0.0  ;;  %v437_v11 = vsel %vm362_vm0, %v436_v10, 0.0  ;;  %v389_v21 = vsel %vm362_vm0, %v388_v20, 0.0  ;;  %v421_v24 = vsel %vm362_vm0, %v420_v23, 0.0 }
  0x58   : > { %406 = vadd.xlane.f32.xlu2 %v405_v9 }
  0x60   : > { %438 = vadd.xlane.f32.xlu2 %v437_v11 }
  0x78   : > { %399 = vperm.xlu2 %877, %v884_v17  }
  0x80   : > { %431 = vperm.xlu2 %877, %v885_v19  }
  0x88   : > { %881 = vset.pattern.permute.xlu2 %v1126_v31 }
  0xcb   : > { %v407_v32 = vpop.xlane.xlu2 %406 }
  0xd3   : > { %v439_v33 = vpop.xlane.xlu2 %438 }
  0xd4   : > { %v383_v13 = vpop.f32.mrf.mxu0 }
  0xd5   : > { %v384_v14 = vadd.f32 %v883_v12, %v383_v13 }
  0xd7   : > { %576 = vrot.lane.b32.xlu1 %v384_v14, %s1123_s9  ;;  %500 = vrot.lane.b32.xlu0 %v384_v14, %s1124_s20  ;;  %s1052_s9 = sshra.s32 %s629_s29, 4  ;;  %s1053_s9 = int_to_ptr.hbm [resolvable:$true] %s1052_s9 }
  0xd8   : > { %771 = vmatpush.xpose.msk.msra.mxu1 %vm362_vm0, %v384_v14  ;;  %s1054_s20 = scalar_lea.hbm %s1053_s9, 32  ;;  %p1059_p7 = scmp.lt.s32.totalorder %s1053_s9, %s1389_s6 }
  0xd9   : > { %p1055_p1 = scmp.ne.s32.totalorder %s1053_s9, %s1054_s20  ;;  %p1060_p9 = scmp.lt.s32.totalorder %s1058_s11, %s1054_s20 }
  0xdb   : > { %772 = vmatmul.msk.f32.vlgmr.msra.gmra.mxu1 %vm362_vm0, %v451_v27  ;;  %v400_v34 = vpop.permute.xlu2 %399  ;;  %p1056_p3 = pnand %p1055_p1, %p1245_p0  ;;  %p1061_p8 = por %p1060_p9, %p1059_p7 }
  0xdd   : > { %p1057_p13 = pneg %p1056_p3 }
  0xdf   : > { %538 = vrot.lane.b32.xlu0 %v384_v14, %s1125_s25  ;;  %p1062_p10 = pnand %p1061_p8, %p1057_p13 }
  0xe3   : > { %v432_v37 = vpop.permute.xlu2 %431 }
 0x101   : > { %390 = vadd.xlane.f32.xlu1 %v389_v21 }
 0x109   : > { %422 = vadd.xlane.f32.xlu0 %v421_v24 }
 0x11a   : > { %415 = vperm.xlu1 %878, %v886_v25  }
 0x11d   : > { %447 = vperm.xlu0 %879, %v887_v26  }
 0x122   : > { %880 = vset.pattern.permute.xlu1 %v1126_v31 }
 0x125   : > { %882 = vset.pattern.permute.xlu0 %v1126_v31 }
 0x149   : > { %v577_v28 = vpop.permute.xlu1 %576  ;;  %v501_v29 = vpop.permute.xlu0 %500 }
 0x14a   : > { %773 = vmatpush.xpose.msk.msra.mxu2 %vm362_vm0, %v501_v29  ;;  %779 = vmatpush.xpose.msk.msrb.mxu1 %vm362_vm0, %v577_v28 }
 0x14d   : > { %774 = vmatmul.msk.f32.vlgmr.msra.gmra.mxu2 %vm362_vm0, %v451_v27  ;;  %780 = vmatmul.msk.f32.vlgmr.msrb.gmra.mxu1 %vm362_vm0, %v451_v27 }
 0x151   : > { %v539_v30 = vpop.permute.xlu0 %538 }
 0x152   : > { %776 = vmatpush.xpose.msk.msra.mxu3 %vm362_vm0, %v539_v30 }
 0x155   : > { %777 = vmatmul.msk.f32.vlgmr.msra.gmra.mxu3 %vm362_vm0, %v451_v27 }
 0x158   : > { %v495_v45 = vpop.f32.mrf.mxu1 }
 0x174   : > { %v391_v35 = vpop.xlane.xlu1 %390 }
 0x175   : > { %v402_v36 = vadd.f32 %v400_v34, %v391_v35 }
 0x177   : > { %454 = vperm.xlu1 %880, %v402_v36  }
 0x17c   : > { %v423_v38 = vpop.xlane.xlu0 %422 }
 0x17d   : > { %v434_v39 = vadd.f32 %v432_v37, %v423_v38 }
 0x17f   : > { %542 = vperm.xlu1 %880, %v434_v39  }
 0x18c   : > { %v416_v40 = vpop.permute.xlu1 %415 }
 0x18d   : > { %v418_v41 = vadd.f32 %v416_v40, %v407_v32 }
 0x18f   : > { %504 = vperm.xlu2 %881, %v418_v41   ;;  %v448_v42 = vpop.permute.xlu0 %447 }
 0x190   : > { %v450_v43 = vadd.f32 %v448_v42, %v439_v33 }
 0x197   : > { %580 = vperm.xlu2 %881, %v450_v43  }
 0x1ca   : > { %v609_v54 = vpop.f32.mrf.mxu1 }
 0x1d0   : > { %v533_v46 = vpop.f32.mrf.mxu2 }
 0x1d8   : > { %v571_v53 = vpop.f32.mrf.mxu3 }
 0x1e9   : > { %v505_v47 = vpop.permute.xlu2 %504  ;;  %v455_v48 = vpop.permute.xlu1 %454 }
 0x1ea   : > { %v506_v49 = vperm.slane %v505_v47, %v457_v44  ;;  %v458_v50 = vperm.slane %v455_v48, %v457_v44 }
 0x1ec   : > { %v496_v51 = vadd.f32 %v495_v45, %v458_v50  ;;  %v534_v52 = vadd.f32 %v533_v46, %v506_v49 }
 0x1ee   : > { %499 = vst.msk [vmem:[%s352_s3] sm:$0xff] %vm498_vm1, %v496_v51 }
 0x1ef   : > { %775 = vst.msk [vmem:[%s352_s3 + $0x8] sm:$0xff] %vm498_vm1, %v534_v52 }
 0x1f1   : > { %v543_v55 = vpop.permute.xlu1 %542  ;;  %v581_v56 = vpop.permute.xlu2 %580 }
 0x1f2   : > { %v544_v57 = vperm.slane %v543_v55, %v457_v44  ;;  %v582_v58 = vperm.slane %v581_v56, %v457_v44 }
 0x1f4   : > { %v572_v59 = vadd.f32 %v571_v53, %v544_v57  ;;  %v610_v60 = vadd.f32 %v609_v54, %v582_v58 }
 0x1f6   : > { %778 = vst.msk [vmem:[%s352_s3 + $0x10] sm:$0xff] %vm498_vm1, %v572_v59 }
 0x1f7   : > { %781 = vst.msk [vmem:[%s352_s3 + $0x18] sm:$0xff] %vm498_vm1, %v610_v60 }
 0x1f8   : > { %1065 = shalt.err (!%p1062_p10)
}
 0x1f9   : > { %s1127_s2 = smov 128   ;;  %s1128_s17 = smov 256  }
 0x1fa   : > { %s1129_s15 = smov 8  }
 0x1fb   : > { %802 = dma.vmem_to_hbm [thread:$0]  (%p1245_p0), %s627_s7, 512, %s629_s29, %s615_s28, %s1127_s2, %s1128_s17, %s1129_s15  }
 0x1fc PF: > { %s643_s16 = sand.u32 1, %s1104_s21   ;;  %p1406_p12 = scmp.ge.s32.totalorder %s1116_s24, 2 }
 0x1fd   : > { %s644_s19 = scalar_lea.sflag [#allocation4], %s643_s16 }
 0x1fe   : > { %p822_p5 = pnand %p1406_p12, %p1251_p6 }
 0x200   : > { %p823_p11 = pneg %p822_p5 }
 0x202   : > { %1099 = dma.done.wait (%p823_p11), %s644_s19, 512  }
 0x203   : > { %1101 = vsyncadd (%p823_p11), %s644_s19, 4294966784  ;;  %s1407_s30 = sld [smem:[#allocation17_spill]]  ;;  %p23_p2 = scmp.ge.s32.totalorder %s1221_s26, 4  }
 0x204   : > { %s1408_s23 = sld [smem:[#allocation18_spill]]  ;;  %s1409_s21 = smov %s1108_s22 }
 0x205   : > { %s1411_s24 = smov %s1221_s26  ;;  %25 = sbr.rel (!%p23_p2) target bundleno = 12 (0xc), region = 117 }
 0x209   : > { %s1410_s22 = smov %s1407_s30 }
 0x20a   :  { %650 = vsyncpa [#allocation3], 1 }
 0x20b   :  { %652 = vsyncpa [#allocation3 + $0x1], 1 }
 0x20c   :  { %653 = vsyncpa [#allocation6], 1 }
 0x20d   :  { %655 = vsyncpa [#allocation6 + $0x1], 1 }
 0x20e   :  { %656 = vsyncpa [#allocation9], 1 }
 0x20f   :  { %657 = vsyncpa [#allocation4], 1 }
 0x210   :  { %659 = vsyncpa [#allocation4 + $0x1], 1 }

</bundles_post_ra>
